<compile_context>
chip_gen: v6e
topology: v6e:2x2x1
jax: 0.10.0
libtpu: 0.0.40
codegen_flags: <defaults>
</compile_context>

<pallas_src>
import functools

import jax
import jax.numpy as jnp
from jax.experimental import pallas as pl
from jax.experimental.pallas import tpu as pltpu


def _round_up(x: int, m: int) -> int:
    return (x + m - 1) // m * m


def scorenet_kernel(x_ref, h_ref, w1x_ref, b1_ref, w2_ref, b2_ref, out_ref, *,
                    noise_col: int, d_out: int):
    x = x_ref[...].astype(jnp.float32)          # (TB, Din_pad)
    h = h_ref[...]                              # (TB, 1) f32

    # Per-row preconditioning coefficients (all (TB, 1); cheap column math).
    c_s = 1.0 / (1.0 + h)                       # 1/(1+h)
    c_in = jax.lax.rsqrt(1.0 + h)               # 1/sqrt(1+h)
    c_noise = 0.125 * jnp.log(h)                # log(h)/8
    inv_out = jax.lax.rsqrt(h + h * h)          # == c_out / h (divide eliminated)

    # Inner MLP input: c_in*x with c_noise injected into padded column
    # `noise_col`; the matching w1n row lives in w1x, so the rank-1 c_noise
    # term rides the MXU for free instead of a VPU broadcast add over (TB, H).
    col = jax.lax.broadcasted_iota(jnp.int32, x.shape, 1)
    x_in = jnp.where(col == noise_col, c_noise, c_in * x)
    x_in = x_in.astype(w1x_ref.dtype)

    pre = jnp.dot(x_in, w1x_ref[...],
                  preferred_element_type=jnp.float32)        # (TB, Hp) f32
    pre = pre + b1_ref[...]                                  # beta folded in b1
    hidden = jax.nn.gelu(pre, approximate=True)
    model_out = jnp.dot(hidden.astype(w2_ref.dtype), w2_ref[...],
                        preferred_element_type=jnp.float32)  # (TB, Dout) f32
    model_out = model_out + b2_ref[...]

    x_res = x if d_out == x.shape[1] else x[:, :d_out]
    # score = (D_theta - x)/h  ==  rsqrt(h + h^2)*model_out - c_s*x
    out_ref[...] = (inv_out * model_out - c_s * x_res).astype(out_ref.dtype)


def scorenet_forward(h_t, x_t, beta, params, *,
                     matmul_dtype=jnp.bfloat16,
                     stream_dtype=jnp.float32,
                     out_dtype=jnp.float32,
                     target_step_bytes=4 << 20):
    """h_t: (B,), x_t: (B, D), beta: scalar. Returns score (B, D)."""
    w1x, w1n, w1b, b1, w2, b2 = params
    B, D = x_t.shape
    H = w1x.shape[1]
    f32 = jnp.float32

    # Lane-dense padding. The first matmul's K dim gets one extra (padded)
    # column to carry c_noise, hence round_up(D + 1, 128).
    Din_pad = _round_up(D + 1, 128)
    Dout_pad = _round_up(D, 128)
    H_pad = _round_up(H, 128)

    x_itm = jnp.dtype(stream_dtype).itemsize
    out_itm = jnp.dtype(out_dtype).itemsize
    w_itm = jnp.dtype(matmul_dtype).itemsize

    # ---- Generation-aware VMEM budget -----------------------------------
    try:
        vmem_cap = int(pltpu.get_tpu_info().vmem_capacity_bytes)
    except Exception:
        vmem_cap = 64 << 20                      # conservative (v7x per-TC)
    budget = int(vmem_cap * 0.85)                # ~15% headroom

    # Resident weights/biases, single-buffered (Buffered(1)); biases sublane-
    # pad to 8 rows in VMEM.
    resident = ((Din_pad * H_pad + H_pad * Dout_pad) * w_itm
                + 8 * (H_pad + Dout_pad) * 4)
    # Streamed tiles (double-buffered): x, lane-padded (TB,1) h, out.
    per_row_stream = 2 * (Din_pad * x_itm + 128 * 4 + Dout_pad * out_itm)
    # In-kernel intermediates: iota + x_in (f32 + matmul dtype), pre/hidden
    # (+ matmul-dtype cast), model_out, small coefficient columns.
    per_row_inter = (Din_pad * (4 + 4 + w_itm) + H_pad * (4 + 4 + w_itm)
                     + Dout_pad * 4 + 5 * 128 * 4)
    per_row = per_row_stream + per_row_inter
    fixed = resident + (2 << 20)                 # compiler scratch headroom

    tb_vmem_cap = max(8, ((budget - fixed) // per_row) // 8 * 8)

    # ---- Batch tile size --------------------------------------------------
    # Target ~target_step_bytes of streamed x+out traffic per grid step so the
    # ~0.35us/step overhead amortizes (>=85%-of-roofline regime), balance the
    # tiles against B (avoid a mostly-padding tail tile), keep >=2 steps when
    # possible so v7x's second TensorCore is not idle, cap by VMEM.
    row_stream_bytes = Din_pad * x_itm + Dout_pad * out_itm
    target_rows = max(8, target_step_bytes // max(1, row_stream_bytes))
    target_rows = min(target_rows, tb_vmem_cap)
    n_steps = pl.cdiv(B, target_rows)
    if B >= 16:
        n_steps = max(n_steps, 2)
    TB = min(_round_up(pl.cdiv(B, n_steps), 8), tb_vmem_cap)
    B_pad = _round_up(B, TB)
    grid = (B_pad // TB,)

    vmem_limit = int(min(budget, max(32 << 20, fixed + per_row * TB + (2 << 20))))

    # ---- Padded operands ---------------------------------------------------
    # h padded with 1.0 so log/rsqrt stay finite on pad rows (sliced off later).
    x_p = jnp.zeros((B_pad, Din_pad), stream_dtype).at[:B, :D].set(
        x_t.astype(stream_dtype))
    h_p = jnp.ones((B_pad, 1), f32).at[:B, 0].set(h_t.astype(f32))

    # Fold the scalar beta into the first-layer bias (drops beta & w1b inputs).
    b1_eff = (b1 + beta * w1b).astype(f32)                   # (1, H)

    def pad2(a, rows, cols, dt):
        return jnp.zeros((rows, cols), dt).at[:a.shape[0], :a.shape[1]].set(
            a.astype(dt))

    # w1n rides in (zero-padded) row D of w1x, matching the in-kernel c_noise
    # column injection.  TODO(synk): fp8 weights on v7x would halve resident
    # VMEM further; kept bf16 for cross-generation accuracy.
    w1x_p = pad2(w1x, Din_pad, H_pad, matmul_dtype).at[D, :H].set(
        w1n[0].astype(matmul_dtype))
    b1_p = pad2(b1_eff, 1, H_pad, f32)
    w2_p = pad2(w2, H_pad, Dout_pad, matmul_dtype)
    b2_p = pad2(b2, 1, Dout_pad, f32)

    kernel = functools.partial(scorenet_kernel, noise_col=D, d_out=Dout_pad)

    def run(single_buffer_weights: bool):
        def resident_spec(shape):
            if single_buffer_weights:
                # Constant index map -> never re-fetched; one buffer suffices.
                return pl.BlockSpec(shape, lambda i: (0, 0),
                                    pipeline_mode=pl.Buffered(1))
            return pl.BlockSpec(shape, lambda i: (0, 0))

        return pl.pallas_call(
            kernel,
            out_shape=jax.ShapeDtypeStruct((B_pad, Dout_pad), out_dtype),
            grid=grid,
            in_specs=[
                pl.BlockSpec((TB, Din_pad), lambda i: (i, 0)),   # x   (streamed)
                pl.BlockSpec((TB, 1), lambda i: (i, 0)),         # h   (streamed)
                resident_spec((Din_pad, H_pad)),                 # w1x (+w1n row)
                resident_spec((1, H_pad)),                       # b1  (+beta*w1b)
                resident_spec((H_pad, Dout_pad)),                # w2
                resident_spec((1, Dout_pad)),                    # b2
            ],
            out_specs=pl.BlockSpec((TB, Dout_pad), lambda i: (i, 0)),
            compiler_params=pltpu.CompilerParams(
                dimension_semantics=("parallel",),
                vmem_limit_bytes=vmem_limit),
        )(x_p, h_p, w1x_p, b1_p, w2_p, b2_p)

    try:
        out_p = run(True)
    except Exception:
        # pipeline_mode=pl.Buffered(1) unsupported on this JAX version:
        # fall back to default double-buffered resident weights.
        out_p = run(False)

    return out_p[:B, :D]


def make_params(key, D, H):
    k1, k2, k3, k4 = jax.random.split(key, 4)
    scale1 = 1.0 / jnp.sqrt(D + 2.0)
    scale2 = 1.0 / jnp.sqrt(float(H))
    w1x = jax.random.normal(k1, (D, H), jnp.float32) * scale1   # weights for x_in
    w1n = jax.random.normal(k2, (1, H), jnp.float32) * scale1   # weights for c_noise
    w1b = jax.random.normal(k3, (1, H), jnp.float32) * scale1   # weights for beta
    b1 = jnp.zeros((1, H), jnp.float32)
    w2 = jax.random.normal(k4, (H, D), jnp.float32) * scale2
    b2 = jnp.zeros((1, D), jnp.float32)
    return (w1x, w1n, w1b, b1, w2, b2)


def scorenet_reference(h_t, x_t, beta, params, matmul_dtype=None):
    """Pure-JAX reference mirroring the PyTorch forward semantics.

    matmul_dtype=None -> full f32 (PyTorch-like). Passing jnp.bfloat16 casts
    the matmul operands like the kernel does (tight numerical cross-check).
    """
    w1x, w1n, w1b, b1, w2, b2 = params
    B = x_t.shape[0]
    beta_v = beta * jnp.ones((B,), jnp.float32)
    c_s = 1.0 / (1.0 + h_t)
    c_in = 1.0 / jnp.sqrt(1.0 + h_t)
    c_out = jnp.sqrt(h_t) * c_in
    c_noise = jnp.log(h_t) / 8.0

    def mm(a, b):
        if matmul_dtype is None:
            return jnp.dot(a, b, preferred_element_type=jnp.float32)
        return jnp.dot(a.astype(matmul_dtype), b.astype(matmul_dtype),
                       preferred_element_type=jnp.float32)

    x_in = c_in[:, None] * x_t
    if matmul_dtype is None:
        pre = mm(x_in, w1x) + c_noise[:, None] * w1n
    else:
        # Mirror the kernel: c_noise rides as an extra K column of the matmul.
        x_aug = jnp.concatenate([x_in, c_noise[:, None]], axis=1)
        w_aug = jnp.concatenate([w1x, w1n], axis=0)
        pre = mm(x_aug, w_aug)
    pre = pre + beta_v[:, None] * w1b + b1
    hidden = jax.nn.gelu(pre, approximate=True)
    model_out = mm(hidden, w2) + b2
    d_theta = c_s[:, None] * x_t + c_out[:, None] * model_out
    return (d_theta - x_t) / h_t[:, None]


if __name__ == "__main__":
    B, D, H = 8, 16, 32
    key = jax.random.PRNGKey(0)
    kx, kh, kp = jax.random.split(key, 3)

    x_t = jax.random.normal(kx, (B, D), jnp.float32)
    h_t = jax.random.uniform(kh, (B,), jnp.float32, minval=0.2, maxval=2.0)
    beta = jnp.float32(0.7)
    params = make_params(kp, D, H)

    out = scorenet_forward(h_t, x_t, beta, params)
    out = jax.block_until_ready(out)
    assert out.shape == (B, D)

    # Tight check vs a reference that applies the same bf16 matmul casts.
    ref_matched = scorenet_reference(h_t, x_t, beta, params,
                                     matmul_dtype=jnp.bfloat16)
    assert jnp.allclose(out, ref_matched, atol=2e-3, rtol=2e-3), \
        "mismatch vs bf16-matched reference"

    # Loose check vs the full-f32 PyTorch-semantics reference (bf16 MXU error).
    ref_f32 = scorenet_reference(h_t, x_t, beta, params)
    assert jnp.allclose(out, ref_f32, atol=1e-1, rtol=1e-1), \
        "mismatch vs f32 reference"

    print("KERNEL_OK")
</pallas_src>

<mosaic_0001>
module attributes {stable_mosaic.version = 11 : i64} {
  func.func @scorenet_kernel(%arg0: i32, %arg1: memref<8x128xf32, #tpu.memory_space<vmem>>, %arg2: memref<8x1xf32, #tpu.memory_space<vmem>>, %arg3: memref<128x128xbf16, #tpu.memory_space<vmem>>, %arg4: memref<1x128xf32, #tpu.memory_space<vmem>>, %arg5: memref<128x128xbf16, #tpu.memory_space<vmem>>, %arg6: memref<1x128xf32, #tpu.memory_space<vmem>>, %arg7: memref<8x128xf32, #tpu.memory_space<vmem>>) attributes {dimension_semantics = [#tpu.dimension_semantics<parallel>], iteration_bounds = array<i64: 1>, scalar_prefetch = 0 : i64, scratch_operands = 0 : i64, tpu.core_type = #tpu.core_type<tc>, window_params = [{transform_indices = @transform_0, window_bounds = array<i64: 8, 128>}, {transform_indices = @transform_1, window_bounds = array<i64: 8, 1>}, {pipeline_mode = #tpu.pipeline_mode<synchronous>, transform_indices = @transform_2, window_bounds = array<i64: 128, 128>}, {pipeline_mode = #tpu.pipeline_mode<synchronous>, transform_indices = @transform_3, window_bounds = array<i64: 1, 128>}, {pipeline_mode = #tpu.pipeline_mode<synchronous>, transform_indices = @transform_4, window_bounds = array<i64: 128, 128>}, {pipeline_mode = #tpu.pipeline_mode<synchronous>, transform_indices = @transform_5, window_bounds = array<i64: 1, 128>}, {transform_indices = @transform_6, window_bounds = array<i64: 8, 128>}]} {
    %c0 = arith.constant 0 : index
    %c0_0 = arith.constant 0 : index
    %0 = vector.load %arg1[%c0, %c0_0] : memref<8x128xf32, #tpu.memory_space<vmem>>, vector<8x128xf32>
    %c0_1 = arith.constant 0 : index
    %c0_2 = arith.constant 0 : index
    %1 = vector.load %arg2[%c0_1, %c0_2] : memref<8x1xf32, #tpu.memory_space<vmem>>, vector<8x1xf32>
    %cst = arith.constant 1.000000e+00 : f32
    %2 = vector.broadcast %cst : f32 to vector<8x1xf32>
    %3 = arith.addf %2, %1 : vector<8x1xf32>
    %cst_3 = arith.constant 1.000000e+00 : f32
    %4 = vector.broadcast %cst_3 : f32 to vector<8x1xf32>
    %5 = arith.divf %4, %3 : vector<8x1xf32>
    %cst_4 = arith.constant 1.000000e+00 : f32
    %6 = vector.broadcast %cst_4 : f32 to vector<8x1xf32>
    %7 = arith.addf %6, %1 : vector<8x1xf32>
    %8 = math.rsqrt %7 : vector<8x1xf32>
    %9 = math.log %1 : vector<8x1xf32>
    %cst_5 = arith.constant 1.250000e-01 : f32
    %10 = vector.broadcast %cst_5 : f32 to vector<8x1xf32>
    %11 = arith.mulf %10, %9 : vector<8x1xf32>
    %12 = arith.mulf %1, %1 : vector<8x1xf32>
    %13 = arith.addf %1, %12 : vector<8x1xf32>
    %14 = math.rsqrt %13 : vector<8x1xf32>
    %15 = tpu.iota {dimensions = array<i32: 1>} : vector<8x128xi32>
    %c16_i32 = arith.constant 16 : i32
    %16 = vector.broadcast %c16_i32 : i32 to vector<8x128xi32>
    %17 = arith.cmpi eq, %15, %16 : vector<8x128xi32>
    %18 = vector.broadcast %8 : vector<8x1xf32> to vector<8x128xf32>
    %19 = arith.mulf %18, %0 : vector<8x128xf32>
    %20 = vector.shape_cast %11 : vector<8x1xf32> to vector<8x1xf32>
    %21 = vector.broadcast %20 : vector<8x1xf32> to vector<8x128xf32>
    %22 = arith.select %17, %21, %19 : vector<8x128xi1>, vector<8x128xf32>
    %23 = arith.truncf %22 : vector<8x128xf32> to vector<8x128xbf16>
    %c0_6 = arith.constant 0 : index
    %c0_7 = arith.constant 0 : index
    %24 = vector.load %arg3[%c0_6, %c0_7] : memref<128x128xbf16, #tpu.memory_space<vmem>>, vector<128x128xbf16>
    %cst_8 = arith.constant dense<0.000000e+00> : vector<8x128xf32>
    %25 = tpu.matmul %23, %24, %cst_8 {dimension_numbers = #tpu.dot_dimension_numbers<[1], [0], [0], [1], [0, 0, 1, 1], [], []>} : vector<8x128xbf16>, vector<128x128xbf16>, vector<8x128xf32> -> vector<8x128xf32>
    %c0_9 = arith.constant 0 : index
    %c0_10 = arith.constant 0 : index
    %26 = vector.load %arg4[%c0_9, %c0_10] : memref<1x128xf32, #tpu.memory_space<vmem>>, vector<1x128xf32>
    %27 = vector.broadcast %26 : vector<1x128xf32> to vector<8x128xf32>
    %28 = arith.addf %25, %27 : vector<8x128xf32>
    %29 = arith.mulf %28, %28 : vector<8x128xf32>
    %30 = arith.mulf %28, %29 : vector<8x128xf32>
    %cst_11 = arith.constant 4.471500e-02 : f32
    %31 = vector.broadcast %cst_11 : f32 to vector<8x128xf32>
    %32 = arith.mulf %31, %30 : vector<8x128xf32>
    %33 = arith.addf %28, %32 : vector<8x128xf32>
    %cst_12 = arith.constant 0.797884583 : f32
    %34 = vector.broadcast %cst_12 : f32 to vector<8x128xf32>
    %35 = arith.mulf %34, %33 : vector<8x128xf32>
    %36 = math.tanh %35 : vector<8x128xf32>
    %cst_13 = arith.constant 1.000000e+00 : f32
    %37 = vector.broadcast %cst_13 : f32 to vector<8x128xf32>
    %38 = arith.addf %37, %36 : vector<8x128xf32>
    %cst_14 = arith.constant 5.000000e-01 : f32
    %39 = vector.broadcast %cst_14 : f32 to vector<8x128xf32>
    %40 = arith.mulf %39, %38 : vector<8x128xf32>
    %41 = arith.mulf %28, %40 : vector<8x128xf32>
    %42 = arith.truncf %41 : vector<8x128xf32> to vector<8x128xbf16>
    %c0_15 = arith.constant 0 : index
    %c0_16 = arith.constant 0 : index
    %43 = vector.load %arg5[%c0_15, %c0_16] : memref<128x128xbf16, #tpu.memory_space<vmem>>, vector<128x128xbf16>
    %cst_17 = arith.constant dense<0.000000e+00> : vector<8x128xf32>
    %44 = tpu.matmul %42, %43, %cst_17 {dimension_numbers = #tpu.dot_dimension_numbers<[1], [0], [0], [1], [0, 0, 1, 1], [], []>} : vector<8x128xbf16>, vector<128x128xbf16>, vector<8x128xf32> -> vector<8x128xf32>
    %c0_18 = arith.constant 0 : index
    %c0_19 = arith.constant 0 : index
    %45 = vector.load %arg6[%c0_18, %c0_19] : memref<1x128xf32, #tpu.memory_space<vmem>>, vector<1x128xf32>
    %46 = vector.broadcast %45 : vector<1x128xf32> to vector<8x128xf32>
    %47 = arith.addf %44, %46 : vector<8x128xf32>
    %48 = vector.broadcast %14 : vector<8x1xf32> to vector<8x128xf32>
    %49 = arith.mulf %48, %47 : vector<8x128xf32>
    %50 = vector.broadcast %5 : vector<8x1xf32> to vector<8x128xf32>
    %51 = arith.mulf %50, %0 : vector<8x128xf32>
    %52 = arith.subf %49, %51 : vector<8x128xf32>
    %c0_20 = arith.constant 0 : index
    %c0_21 = arith.constant 0 : index
    %53 = vector.load %arg7[%c0_20, %c0_21] : memref<8x128xf32, #tpu.memory_space<vmem>>, vector<8x128xf32>
    tpu.vector_store %arg7[%c0_20, %c0_21], %52 {strides = array<i32>} : memref<8x128xf32, #tpu.memory_space<vmem>>, vector<8x128xf32>,
    return
  }
  func.func @transform_0(%arg0: i32) -> (i32, i32) {
    %c0_i32 = arith.constant 0 : i32
    %c0_i32_0 = arith.constant 0 : i32
    return %arg0, %c0_i32 : i32, i32
  }
  func.func @transform_1(%arg0: i32) -> (i32, i32) {
    %c0_i32 = arith.constant 0 : i32
    %c0_i32_0 = arith.constant 0 : i32
    return %arg0, %c0_i32 : i32, i32
  }
  func.func @transform_2(%arg0: i32) -> (i32, i32) {
    %c0_i32 = arith.constant 0 : i32
    %c0_i32_0 = arith.constant 0 : i32
    %c0_i32_1 = arith.constant 0 : i32
    return %c0_i32, %c0_i32_0 : i32, i32
  }
  func.func @transform_3(%arg0: i32) -> (i32, i32) {
    %c0_i32 = arith.constant 0 : i32
    %c0_i32_0 = arith.constant 0 : i32
    %c0_i32_1 = arith.constant 0 : i32
    return %c0_i32, %c0_i32_0 : i32, i32
  }
  func.func @transform_4(%arg0: i32) -> (i32, i32) {
    %c0_i32 = arith.constant 0 : i32
    %c0_i32_0 = arith.constant 0 : i32
    %c0_i32_1 = arith.constant 0 : i32
    return %c0_i32, %c0_i32_0 : i32, i32
  }
  func.func @transform_5(%arg0: i32) -> (i32, i32) {
    %c0_i32 = arith.constant 0 : i32
    %c0_i32_0 = arith.constant 0 : i32
    %c0_i32_1 = arith.constant 0 : i32
    return %c0_i32, %c0_i32_0 : i32, i32
  }
  func.func @transform_6(%arg0: i32) -> (i32, i32) {
    %c0_i32 = arith.constant 0 : i32
    %c0_i32_0 = arith.constant 0 : i32
    return %arg0, %c0_i32 : i32, i32
  }
}

module attributes {stable_mosaic.version = 11 : i64} {
  func.func @scorenet_kernel(%arg0: i32, %arg1: memref<8x128xf32, #tpu.memory_space<vmem>>, %arg2: memref<8x1xf32, #tpu.memory_space<vmem>>, %arg3: memref<128x128xbf16, #tpu.memory_space<vmem>>, %arg4: memref<1x128xf32, #tpu.memory_space<vmem>>, %arg5: memref<128x128xbf16, #tpu.memory_space<vmem>>, %arg6: memref<1x128xf32, #tpu.memory_space<vmem>>, %arg7: memref<8x128xf32, #tpu.memory_space<vmem>>) attributes {dimension_semantics = [#tpu.dimension_semantics<parallel>], iteration_bounds = array<i64: 1>, scalar_prefetch = 0 : i64, scratch_operands = 0 : i64, tpu.core_type = #tpu.core_type<tc>, window_params = [{transform_indices = @transform_0, window_bounds = array<i64: 8, 128>}, {transform_indices = @transform_1, window_bounds = array<i64: 8, 1>}, {pipeline_mode = #tpu.pipeline_mode<synchronous>, transform_indices = @transform_2, window_bounds = array<i64: 128, 128>}, {pipeline_mode = #tpu.pipeline_mode<synchronous>, transform_indices = @transform_3, window_bounds = array<i64: 1, 128>}, {pipeline_mode = #tpu.pipeline_mode<synchronous>, transform_indices = @transform_4, window_bounds = array<i64: 128, 128>}, {pipeline_mode = #tpu.pipeline_mode<synchronous>, transform_indices = @transform_5, window_bounds = array<i64: 1, 128>}, {transform_indices = @transform_6, window_bounds = array<i64: 8, 128>}]} {
    %c0 = arith.constant 0 : index
    %c0_0 = arith.constant 0 : index
    %0 = vector.load %arg1[%c0, %c0_0] : memref<8x128xf32, #tpu.memory_space<vmem>>, vector<8x128xf32>
    %c0_1 = arith.constant 0 : index
    %c0_2 = arith.constant 0 : index
    %1 = vector.load %arg2[%c0_1, %c0_2] : memref<8x1xf32, #tpu.memory_space<vmem>>, vector<8x1xf32>
    %cst = arith.constant 1.000000e+00 : f32
    %2 = vector.broadcast %cst : f32 to vector<8x1xf32>
    %3 = arith.addf %2, %1 : vector<8x1xf32>
    %cst_3 = arith.constant 1.000000e+00 : f32
    %4 = vector.broadcast %cst_3 : f32 to vector<8x1xf32>
    %5 = arith.divf %4, %3 : vector<8x1xf32>
    %cst_4 = arith.constant 1.000000e+00 : f32
    %6 = vector.broadcast %cst_4 : f32 to vector<8x1xf32>
    %7 = arith.addf %6, %1 : vector<8x1xf32>
    %8 = math.rsqrt %7 : vector<8x1xf32>
    %9 = math.log %1 : vector<8x1xf32>
    %cst_5 = arith.constant 1.250000e-01 : f32
    %10 = vector.broadcast %cst_5 : f32 to vector<8x1xf32>
    %11 = arith.mulf %10, %9 : vector<8x1xf32>
    %12 = arith.mulf %1, %1 : vector<8x1xf32>
    %13 = arith.addf %1, %12 : vector<8x1xf32>
    %14 = math.rsqrt %13 : vector<8x1xf32>
    %15 = tpu.iota {dimensions = array<i32: 1>} : vector<8x128xi32>
    %c16_i32 = arith.constant 16 : i32
    %16 = vector.broadcast %c16_i32 : i32 to vector<8x128xi32>
    %17 = arith.cmpi eq, %15, %16 : vector<8x128xi32>
    %18 = vector.broadcast %8 : vector<8x1xf32> to vector<8x128xf32>
    %19 = arith.mulf %18, %0 : vector<8x128xf32>
    %20 = vector.shape_cast %11 : vector<8x1xf32> to vector<8x1xf32>
    %21 = vector.broadcast %20 : vector<8x1xf32> to vector<8x128xf32>
    %22 = arith.select %17, %21, %19 : vector<8x128xi1>, vector<8x128xf32>
    %23 = arith.truncf %22 : vector<8x128xf32> to vector<8x128xbf16>
    %c0_6 = arith.constant 0 : index
    %c0_7 = arith.constant 0 : index
    %24 = vector.load %arg3[%c0_6, %c0_7] : memref<128x128xbf16, #tpu.memory_space<vmem>>, vector<128x128xbf16>
    %cst_8 = arith.constant dense<0.000000e+00> : vector<8x128xf32>
    %25 = tpu.matmul %23, %24, %cst_8 {dimension_numbers = #tpu.dot_dimension_numbers<[1], [0], [0], [1], [0, 0, 1, 1], [], []>} : vector<8x128xbf16>, vector<128x128xbf16>, vector<8x128xf32> -> vector<8x128xf32>
    %c0_9 = arith.constant 0 : index
    %c0_10 = arith.constant 0 : index
    %26 = vector.load %arg4[%c0_9, %c0_10] : memref<1x128xf32, #tpu.memory_space<vmem>>, vector<1x128xf32>
    %27 = vector.broadcast %26 : vector<1x128xf32> to vector<8x128xf32>
    %28 = arith.addf %25, %27 : vector<8x128xf32>
    %29 = arith.mulf %28, %28 : vector<8x128xf32>
    %30 = arith.mulf %28, %29 : vector<8x128xf32>
    %cst_11 = arith.constant 4.471500e-02 : f32
    %31 = vector.broadcast %cst_11 : f32 to vector<8x128xf32>
    %32 = arith.mulf %31, %30 : vector<8x128xf32>
    %33 = arith.addf %28, %32 : vector<8x128xf32>
    %cst_12 = arith.constant 0.797884583 : f32
    %34 = vector.broadcast %cst_12 : f32 to vector<8x128xf32>
    %35 = arith.mulf %34, %33 : vector<8x128xf32>
    %36 = math.tanh %35 : vector<8x128xf32>
    %cst_13 = arith.constant 1.000000e+00 : f32
    %37 = vector.broadcast %cst_13 : f32 to vector<8x128xf32>
    %38 = arith.addf %37, %36 : vector<8x128xf32>
    %cst_14 = arith.constant 5.000000e-01 : f32
    %39 = vector.broadcast %cst_14 : f32 to vector<8x128xf32>
    %40 = arith.mulf %39, %38 : vector<8x128xf32>
    %41 = arith.mulf %28, %40 : vector<8x128xf32>
    %42 = arith.truncf %41 : vector<8x128xf32> to vector<8x128xbf16>
    %c0_15 = arith.constant 0 : index
    %c0_16 = arith.constant 0 : index
    %43 = vector.load %arg5[%c0_15, %c0_16] : memref<128x128xbf16, #tpu.memory_space<vmem>>, vector<128x128xbf16>
    %cst_17 = arith.constant dense<0.000000e+00> : vector<8x128xf32>
    %44 = tpu.matmul %42, %43, %cst_17 {dimension_numbers = #tpu.dot_dimension_numbers<[1], [0], [0], [1], [0, 0, 1, 1], [], []>} : vector<8x128xbf16>, vector<128x128xbf16>, vector<8x128xf32> -> vector<8x128xf32>
    %c0_18 = arith.constant 0 : index
    %c0_19 = arith.constant 0 : index
    %45 = vector.load %arg6[%c0_18, %c0_19] : memref<1x128xf32, #tpu.memory_space<vmem>>, vector<1x128xf32>
    %46 = vector.broadcast %45 : vector<1x128xf32> to vector<8x128xf32>
    %47 = arith.addf %44, %46 : vector<8x128xf32>
    %48 = vector.broadcast %14 : vector<8x1xf32> to vector<8x128xf32>
    %49 = arith.mulf %48, %47 : vector<8x128xf32>
    %50 = vector.broadcast %5 : vector<8x1xf32> to vector<8x128xf32>
    %51 = arith.mulf %50, %0 : vector<8x128xf32>
    %52 = arith.subf %49, %51 : vector<8x128xf32>
    %c0_20 = arith.constant 0 : index
    %c0_21 = arith.constant 0 : index
    %53 = vector.load %arg7[%c0_20, %c0_21] : memref<8x128xf32, #tpu.memory_space<vmem>>, vector<8x128xf32>
    tpu.vector_store %arg7[%c0_20, %c0_21], %52 {strides = array<i32>} : memref<8x128xf32, #tpu.memory_space<vmem>>, vector<8x128xf32>,
    return
  }
  func.func @transform_0(%arg0: i32) -> (i32, i32) {
    %c0_i32 = arith.constant 0 : i32
    %c0_i32_0 = arith.constant 0 : i32
    return %arg0, %c0_i32 : i32, i32
  }
  func.func @transform_1(%arg0: i32) -> (i32, i32) {
    %c0_i32 = arith.constant 0 : i32
    %c0_i32_0 = arith.constant 0 : i32
    return %arg0, %c0_i32 : i32, i32
  }
  func.func @transform_2(%arg0: i32) -> (i32, i32) {
    %c0_i32 = arith.constant 0 : i32
    %c0_i32_0 = arith.constant 0 : i32
    %c0_i32_1 = arith.constant 0 : i32
    return %c0_i32, %c0_i32_0 : i32, i32
  }
  func.func @transform_3(%arg0: i32) -> (i32, i32) {
    %c0_i32 = arith.constant 0 : i32
    %c0_i32_0 = arith.constant 0 : i32
    %c0_i32_1 = arith.constant 0 : i32
    return %c0_i32, %c0_i32_0 : i32, i32
  }
  func.func @transform_4(%arg0: i32) -> (i32, i32) {
    %c0_i32 = arith.constant 0 : i32
    %c0_i32_0 = arith.constant 0 : i32
    %c0_i32_1 = arith.constant 0 : i32
    return %c0_i32, %c0_i32_0 : i32, i32
  }
  func.func @transform_5(%arg0: i32) -> (i32, i32) {
    %c0_i32 = arith.constant 0 : i32
    %c0_i32_0 = arith.constant 0 : i32
    %c0_i32_1 = arith.constant 0 : i32
    return %c0_i32, %c0_i32_0 : i32, i32
  }
  func.func @transform_6(%arg0: i32) -> (i32, i32) {
    %c0_i32 = arith.constant 0 : i32
    %c0_i32_0 = arith.constant 0 : i32
    return %arg0, %c0_i32 : i32, i32
  }
}

</mosaic_0001>

<bundles_post_ra>
// kernel: tpu_custom_call.1
= control target key start
LH: loop header
LB: loop body
LE: loop exit
PB: predicated region body
PF: predicated region fallthrough
CT: control target
= control target key end

     0   :  { %11 = vsyncpa [#allocation3], 0  ;;  %s618_s0 = inlined_call_operand.vmem [shape: f32[8,128], index: 0, kind: input, shape index: {}]   ;;  %s619_s1 = inlined_call_operand.vmem [shape: f32[8,1], index: 1, kind: input, shape index: {}]   ;;  %s620_s2 = inlined_call_operand.hbm [shape: bf16[128,128], index: 2, kind: input, shape index: {}]   ;;  %s621_s3 = inlined_call_operand.vmem [shape: f32[1,128], index: 3, kind: input, shape index: {}]   ;;  %s622_s4 = inlined_call_operand.hbm [shape: bf16[128,128], index: 4, kind: input, shape index: {}]   ;;  %s623_s5 = inlined_call_operand.vmem [shape: f32[1,128], index: 5, kind: input, shape index: {}]   ;;  %s624_s6 = inlined_call_operand.hbm [shape: f32[8,128], index: 6, kind: output, shape index: {}]  }
   0x1   :  { %12 = vsyncpa [#allocation6], 0 }
   0x2   :  { %13 = vsyncpa [#allocation4], 0  ;;  %s521_s21 = smov [#allocation2]  }
   0x3   :  { %s23_s22 = sshll.u32 %s521_s21, 4  ;;  %s24_s22 = int_to_ptr.vmem [resolvable:$true] %s23_s22 }
   0x4   :  { %s463_s23 = scalar_lea.vmem %s24_s22, 1024  ;;  %p468_p1 = scmp.lt.s32.totalorder %s24_s22, %s24_s22 }
   0x5   :  { %p464_p0 = scmp.ne.s32.totalorder %s24_s22, %s463_s23  ;;  %p469_p2 = scmp.lt.s32.totalorder %s463_s23, %s463_s23 }
   0x7   :  { %p470_p3 = por %p469_p2, %p468_p1 }
   0x9   :  { %p471_p4 = pnand %p470_p3, %p464_p0 }
   0xb   :  { %474 = shalt.err (!%p471_p4)
}
   0xc   :  { %s522_s24 = smov 64   ;;  %s523_s25 = smov 4  }
   0xd   :  { %29 = dma.hbm_to_vmem [thread:$0]  %s620_s2, 1024, %s24_s22, [#allocation3], %s522_s24, %s522_s24, %s523_s25  }
   0xe   :  { %s524_s28 = smov [#allocation5]  }
   0xf   :  { %s37_s29 = sshll.u32 %s524_s28, 4  ;;  %s38_s29 = int_to_ptr.vmem [resolvable:$true] %s37_s29 }
  0x10   :  { %s483_s30 = scalar_lea.vmem %s38_s29, 1024  ;;  %p488_p6 = scmp.lt.s32.totalorder %s38_s29, %s38_s29 }
  0x11   :  { %p484_p5 = scmp.ne.s32.totalorder %s38_s29, %s483_s30  ;;  %p489_p7 = scmp.lt.s32.totalorder %s483_s30, %s483_s30 }
  0x13   :  { %p490_p8 = por %p489_p7, %p488_p6 }
  0x15   :  { %p491_p9 = pnand %p490_p8, %p484_p5 }
  0x17   :  { %494 = shalt.err (!%p491_p9)
}
  0x18   :  { %43 = dma.hbm_to_vmem [thread:$0]  %s622_s4, 1024, %s38_s29, [#allocation6], %s522_s24, %s522_s24, %s523_s25  }
  0x19   :  { %515 = dma.done.wait [#allocation3], 1024  }
  0x1a   :  { %516 = vsyncadd [#allocation3], 4294966272 }
  0x1b   :  { %517 = dma.done.wait [#allocation6], 1024  }
  0x1c   :  { %518 = vsyncadd [#allocation6], 4294966272  ;;  %v525_v0 = vmov 0   ;;  %v526_v1 = vmov 0.0   ;;  %v575_v2 = vld [vmem:[%s619_s1] sm:$0xff]  ;;  %v429_v4 = vld [vmem:[#allocation2 + $0x38] sm:$0xff]   ;;  %v65_v16 = vlaneseq }
  0x1d   :  { %427 = vset.pattern.permute.xlu0 %v525_v0  ;;  %379 = vmatprep.subr.bf16.mxu0 %v526_v1  ;;  %v578_v3 = vadd.f32 1.0, %v575_v2  ;;  %445 = vlog2.f32 %v575_v2  ;;  %v430_v5 = vld [vmem:[#allocation2 + $0x30] sm:$0xff]   ;;  %v431_v6 = vld [vmem:[#allocation2 + $0x28] sm:$0xff]   ;;  %v432_v7 = vld [vmem:[#allocation2 + $0x20] sm:$0xff]   ;;  %vm527_vm0 = vmmov 0   ;;  %v62_v32 = vmul.f32 %v575_v2, %v575_v2  ;;  %s528_s12 = smov [#allocation7]  }
  0x1e   :  { %399 = vmatprep.subr.bf16.mxu1 %v526_v1  ;;  %428 = vset.pattern.permute.xlu1 %v525_v0  ;;  %v433_v10 = vld [vmem:[#allocation2 + $0x18] sm:$0xff]   ;;  %v434_v13 = vld [vmem:[#allocation2 + $0x10] sm:$0xff]   ;;  %v435_v14 = vld [vmem:[#allocation2 + $0x8] sm:$0xff]   ;;  %v66_v17 = vand.u32 127, %v65_v16  ;;  %s333_s13 = sshll.u32 %s528_s12, 4  ;;  %s334_s13 = int_to_ptr.vmem [resolvable:$true] %s333_s13 }
  0x1f   :  { %447 = vrsqrt.f32 %v578_v3  ;;  %380 = vmatpush3.bf16.msra.mxu0 %v429_v4  ;;  %395 = vmatprep.mubr.msk.bf16.mxu0 %vm527_vm0, %v526_v1  ;;  %v436_v15 = vld [vmem:[#allocation2] sm:$0xff]   ;;  %v437_v24 = vld [vmem:[#allocation5 + $0x38] sm:$0xff]   ;;  %v438_v25 = vld [vmem:[#allocation5 + $0x30] sm:$0xff]   ;;  %v63_v33 = vadd.f32 %v62_v32, %v575_v2  ;;  %s495_s14 = scalar_lea.vmem %s334_s13, 128  ;;  %p500_p11 = scmp.lt.s32.totalorder %s334_s13, %s334_s13 }
  0x20   :  { %381 = vmatprep.subr.bf16.mxu0 %v526_v1  ;;  %415 = vmatprep.mubr.msk.bf16.mxu1 %vm527_vm0, %v526_v1  ;;  %v594_v19 = vld [vmem:[%s618_s0] sm:$0xff]  ;;  %vm67_vm1 = vcmp.eq.s32.totalorder %v66_v17, 16  ;;  %v439_v26 = vld [vmem:[#allocation5 + $0x28] sm:$0xff]   ;;  %v441_v28 = vld [vmem:[#allocation5 + $0x18] sm:$0xff]   ;;  %p496_p10 = scmp.ne.s32.totalorder %s334_s13, %s495_s14  ;;  %p501_p12 = scmp.lt.s32.totalorder %s495_s14, %s495_s14 }
  0x21   :  { %400 = vmatpush3.bf16.msra.mxu1 %v437_v24  ;;  %v440_v27 = vld [vmem:[#allocation5 + $0x20] sm:$0xff]   ;;  %v442_v29 = vld [vmem:[#allocation5 + $0x10] sm:$0xff]   ;;  %v443_v30 = vld [vmem:[#allocation5 + $0x8] sm:$0xff]   ;;  %449 = vrsqrt.f32 %v63_v33 }
  0x22   :  { %401 = vmatprep.subr.bf16.mxu1 %v526_v1  ;;  %v444_v31 = vld [vmem:[#allocation5] sm:$0xff]   ;;  %451 = vrcp.f32 %v578_v3  ;;  %p502_p13 = por %p501_p12, %p500_p11 }
  0x23   :  { %382 = vmatpush3.bf16.msra.mxu0 %v430_v5  ;;  %v343_v36 = vld [vmem:[%s621_s3] ss:$0 sm:$0xff] }
  0x24   :  { %383 = vmatprep.subr.bf16.mxu0 %v526_v1  ;;  %v352_v53 = vld [vmem:[%s623_s5] ss:$0 sm:$0xff]  ;;  %p503_p0 = pnand %p502_p13, %p496_p10 }
  0x25   :  { %402 = vmatpush3.bf16.msra.mxu1 %v438_v25 }
  0x26   :  { %403 = vmatprep.subr.bf16.mxu1 %v526_v1 }
  0x27   :  { %384 = vmatpush3.bf16.msra.mxu0 %v431_v6 }
  0x28   :  { %385 = vmatprep.subr.bf16.mxu0 %v526_v1 }
  0x29   :  { %404 = vmatpush3.bf16.msra.mxu1 %v439_v26 }
  0x2a   :  { %v446_v8 = vpop.eup %445  ;;  %405 = vmatprep.subr.bf16.mxu1 %v526_v1 }
  0x2b   :  { %v60_v9 = vmul.f32 0.6931472, %v446_v8  ;;  %386 = vmatpush3.bf16.msra.mxu0 %v432_v7 }
  0x2c   :  { %v448_v11 = vpop.eup %447  ;;  %387 = vmatprep.subr.bf16.mxu0 %v526_v1 }
  0x2d   :  { %70 = vperm.xlu0 %427, %v448_v11   ;;  %v61_v12 = vmul.f32 0.125, %v60_v9  ;;  %406 = vmatpush3.bf16.msra.mxu1 %v440_v27 }
  0x2e   :  { %407 = vmatprep.subr.bf16.mxu1 %v526_v1  ;;  %v450_v34 = vpop.eup %449 }
  0x2f   :  { %388 = vmatpush3.bf16.msra.mxu0 %v433_v10  ;;  %315 = vperm.xlu1 %428, %v450_v34   ;;  %v452_v35 = vpop.eup %451 }
  0x30   :  { %389 = vmatprep.subr.bf16.mxu0 %v526_v1 }
  0x31   :  { %76 = vperm.xlu0 %427, %v61_v12   ;;  %408 = vmatpush3.bf16.msra.mxu1 %v441_v28 }
  0x32   :  { %409 = vmatprep.subr.bf16.mxu1 %v526_v1 }
  0x33   :  { %390 = vmatpush3.bf16.msra.mxu0 %v434_v13  ;;  %321 = vperm.xlu1 %428, %v452_v35  }
  0x34   :  { %391 = vmatprep.subr.bf16.mxu0 %v526_v1 }
  0x35   :  { %410 = vmatpush3.bf16.msra.mxu1 %v442_v29 }
  0x36   :  { %411 = vmatprep.subr.bf16.mxu1 %v526_v1 }
  0x37   :  { %392 = vmatpush3.bf16.msra.mxu0 %v435_v14 }
  0x38   :  { %393 = vmatprep.subr.bf16.mxu0 %v526_v1 }
  0x39   :  { %412 = vmatpush3.bf16.msra.mxu1 %v443_v30 }
  0x3a   :  { %413 = vmatprep.subr.bf16.mxu1 %v526_v1 }
  0x3b   :  { %394 = vmatpush3.bf16.msra.mxu0 %v436_v15 }
  0x3d   :  { %414 = vmatpush3.bf16.msra.mxu1 %v444_v31 }
  0xa8   :  { %v71_v18 = vpop.permute.xlu0 %70 }
  0xa9   :  { %v73_v20 = vmul.f32 %v71_v18, %v594_v19 }
  0xaa   :  { %v316_v52 = vpop.permute.xlu1 %315 }
  0xac   :  { %v77_v21 = vpop.permute.xlu0 %76 }
  0xad   :  { %v79_v22 = vsel %vm67_vm1, %v77_v21, %v73_v20 }
  0xae   :  { %v80_v23 = vpack.c.bf16 %v79_v22, %v79_v22  ;;  %v322_v54 = vpop.permute.xlu1 %321 }
  0xaf   :  { %v324_v58 = vmul.f32 %v322_v54, %v594_v19 }
  0xb0   :  { %396 = vmatmul.mubr.bf16.vlgmr.msra.gmra.mxu0 %v80_v23 }
 0x170   :  { %v186_v37 = vpop.f32.mrf.mxu0 }
 0x171   :  { %v187_v38 = vadd.f32 %v343_v36, %v186_v37 }
 0x172   :  { %v397_v39 = vpop.f32.mrf.mxu0 }
 0x173   :  { %v192_v40 = vmul.f32 %v187_v38, %v187_v38 }
 0x174   :  { %v189_v41 = vpop.f32.mrf.mxu0 }
 0x175   :  { %v193_v42 = vmul.f32 %v192_v40, %v187_v38 }
 0x176   :  { %v398_v43 = vpop.f32.mrf.mxu0 }
 0x177   :  { %v194_v44 = vmul.f32 0.044715, %v193_v42 }
 0x179   :  { %v195_v45 = vadd.f32 %v194_v44, %v187_v38 }
 0x17b   :  { %v196_v46 = vmul.f32 0.7978846, %v195_v45 }
 0x17d   :  { %453 = vtanh.f32 %v196_v46 }
 0x18a   :  { %v454_v47 = vpop.eup %453 }
 0x18b   :  { %v198_v48 = vadd.f32 1.0, %v454_v47 }
 0x18d   :  { %v199_v49 = vmul.f32 0.5, %v198_v48 }
 0x18f   :  { %v200_v50 = vmul.f32 %v199_v49, %v187_v38 }
 0x191   :  { %v201_v51 = vpack.c.bf16 %v200_v50, %v200_v50 }
 0x193   :  { %416 = vmatmul.mubr.bf16.vlgmr.msra.gmra.mxu1 %v201_v51 }
 0x253   :  { %v307_v55 = vpop.f32.mrf.mxu1 }
 0x254   :  { %v308_v56 = vadd.f32 %v352_v53, %v307_v55 }
 0x255   :  { %v417_v57 = vpop.f32.mrf.mxu1 }
 0x256   :  { %v318_v59 = vmul.f32 %v316_v52, %v308_v56 }
 0x257   :  { %v310_v60 = vpop.f32.mrf.mxu1 }
 0x258   :  { %v325_v61 = vsub.f32 %v318_v59, %v324_v58 }
 0x259   :  { %v418_v62 = vpop.f32.mrf.mxu1 }
 0x25a   :  { %326 = vst [vmem:[#allocation7] sm:$0xff] %v325_v61 }
 0x25b   :  { %506 = shalt.err (!%p503_p0)
}
 0x25c   :  { %336 = dma.vmem_to_hbm [thread:$0]  %s334_s13, 128, %s624_s6, [#allocation4]  }
 0x25d   :  { %519 = dma.done.wait [#allocation4], 128  }
 0x25e   :  { %520 = vsyncadd [#allocation4], 4294967168 }
 0x25f   :  { %340 = vsyncpa [#allocation3], 1 }
 0x260   :  { %341 = vsyncpa [#allocation6], 1 }
 0x261   :  { %342 = vsyncpa [#allocation4], 1 }

// kernel: tpu_custom_call.1
= control target key start
LH: loop header
LB: loop body
LE: loop exit
PB: predicated region body
PF: predicated region fallthrough
CT: control target
= control target key end

     0   :  { %11 = vsyncpa [#allocation3], 0  ;;  %s618_s0 = inlined_call_operand.vmem [shape: f32[8,128], index: 0, kind: input, shape index: {}]   ;;  %s619_s1 = inlined_call_operand.vmem [shape: f32[8,1], index: 1, kind: input, shape index: {}]   ;;  %s620_s2 = inlined_call_operand.hbm [shape: bf16[128,128], index: 2, kind: input, shape index: {}]   ;;  %s621_s3 = inlined_call_operand.vmem [shape: f32[1,128], index: 3, kind: input, shape index: {}]   ;;  %s622_s4 = inlined_call_operand.hbm [shape: bf16[128,128], index: 4, kind: input, shape index: {}]   ;;  %s623_s5 = inlined_call_operand.vmem [shape: f32[1,128], index: 5, kind: input, shape index: {}]   ;;  %s624_s6 = inlined_call_operand.hbm [shape: f32[8,128], index: 6, kind: output, shape index: {}]  }
   0x1   :  { %12 = vsyncpa [#allocation6], 0 }
   0x2   :  { %13 = vsyncpa [#allocation4], 0  ;;  %s521_s21 = smov [#allocation2]  }
   0x3   :  { %s23_s22 = sshll.u32 %s521_s21, 4  ;;  %s24_s22 = int_to_ptr.vmem [resolvable:$true] %s23_s22 }
   0x4   :  { %s463_s23 = scalar_lea.vmem %s24_s22, 1024  ;;  %p468_p1 = scmp.lt.s32.totalorder %s24_s22, %s24_s22 }
   0x5   :  { %p464_p0 = scmp.ne.s32.totalorder %s24_s22, %s463_s23  ;;  %p469_p2 = scmp.lt.s32.totalorder %s463_s23, %s463_s23 }
   0x7   :  { %p470_p3 = por %p469_p2, %p468_p1 }
   0x9   :  { %p471_p4 = pnand %p470_p3, %p464_p0 }
   0xb   :  { %474 = shalt.err (!%p471_p4)
}
   0xc   :  { %s522_s24 = smov 64   ;;  %s523_s25 = smov 4  }
   0xd   :  { %29 = dma.hbm_to_vmem [thread:$0]  %s620_s2, 1024, %s24_s22, [#allocation3], %s522_s24, %s522_s24, %s523_s25  }
   0xe   :  { %s524_s28 = smov [#allocation5]  }
   0xf   :  { %s37_s29 = sshll.u32 %s524_s28, 4  ;;  %s38_s29 = int_to_ptr.vmem [resolvable:$true] %s37_s29 }
  0x10   :  { %s483_s30 = scalar_lea.vmem %s38_s29, 1024  ;;  %p488_p6 = scmp.lt.s32.totalorder %s38_s29, %s38_s29 }
  0x11   :  { %p484_p5 = scmp.ne.s32.totalorder %s38_s29, %s483_s30  ;;  %p489_p7 = scmp.lt.s32.totalorder %s483_s30, %s483_s30 }
  0x13   :  { %p490_p8 = por %p489_p7, %p488_p6 }
  0x15   :  { %p491_p9 = pnand %p490_p8, %p484_p5 }
  0x17   :  { %494 = shalt.err (!%p491_p9)
}
  0x18   :  { %43 = dma.hbm_to_vmem [thread:$0]  %s622_s4, 1024, %s38_s29, [#allocation6], %s522_s24, %s522_s24, %s523_s25  }
  0x19   :  { %515 = dma.done.wait [#allocation3], 1024  }
  0x1a   :  { %516 = vsyncadd [#allocation3], 4294966272 }
  0x1b   :  { %517 = dma.done.wait [#allocation6], 1024  }
  0x1c   :  { %518 = vsyncadd [#allocation6], 4294966272  ;;  %v525_v0 = vmov 0   ;;  %v526_v1 = vmov 0.0   ;;  %v575_v2 = vld [vmem:[%s619_s1] sm:$0xff]  ;;  %v429_v4 = vld [vmem:[#allocation2 + $0x38] sm:$0xff]   ;;  %v65_v16 = vlaneseq }
  0x1d   :  { %427 = vset.pattern.permute.xlu0 %v525_v0  ;;  %379 = vmatprep.subr.bf16.mxu0 %v526_v1  ;;  %v578_v3 = vadd.f32 1.0, %v575_v2  ;;  %445 = vlog2.f32 %v575_v2  ;;  %v430_v5 = vld [vmem:[#allocation2 + $0x30] sm:$0xff]   ;;  %v431_v6 = vld [vmem:[#allocation2 + $0x28] sm:$0xff]   ;;  %v432_v7 = vld [vmem:[#allocation2 + $0x20] sm:$0xff]   ;;  %vm527_vm0 = vmmov 0   ;;  %v62_v32 = vmul.f32 %v575_v2, %v575_v2  ;;  %s528_s12 = smov [#allocation7]  }
  0x1e   :  { %399 = vmatprep.subr.bf16.mxu1 %v526_v1  ;;  %428 = vset.pattern.permute.xlu1 %v525_v0  ;;  %v433_v10 = vld [vmem:[#allocation2 + $0x18] sm:$0xff]   ;;  %v434_v13 = vld [vmem:[#allocation2 + $0x10] sm:$0xff]   ;;  %v435_v14 = vld [vmem:[#allocation2 + $0x8] sm:$0xff]   ;;  %v66_v17 = vand.u32 127, %v65_v16  ;;  %s333_s13 = sshll.u32 %s528_s12, 4  ;;  %s334_s13 = int_to_ptr.vmem [resolvable:$true] %s333_s13 }
  0x1f   :  { %447 = vrsqrt.f32 %v578_v3  ;;  %380 = vmatpush3.bf16.msra.mxu0 %v429_v4  ;;  %395 = vmatprep.mubr.msk.bf16.mxu0 %vm527_vm0, %v526_v1  ;;  %v436_v15 = vld [vmem:[#allocation2] sm:$0xff]   ;;  %v437_v24 = vld [vmem:[#allocation5 + $0x38] sm:$0xff]   ;;  %v438_v25 = vld [vmem:[#allocation5 + $0x30] sm:$0xff]   ;;  %v63_v33 = vadd.f32 %v62_v32, %v575_v2  ;;  %s495_s14 = scalar_lea.vmem %s334_s13, 128  ;;  %p500_p11 = scmp.lt.s32.totalorder %s334_s13, %s334_s13 }
  0x20   :  { %381 = vmatprep.subr.bf16.mxu0 %v526_v1  ;;  %415 = vmatprep.mubr.msk.bf16.mxu1 %vm527_vm0, %v526_v1  ;;  %v594_v19 = vld [vmem:[%s618_s0] sm:$0xff]  ;;  %vm67_vm1 = vcmp.eq.s32.totalorder %v66_v17, 16  ;;  %v439_v26 = vld [vmem:[#allocation5 + $0x28] sm:$0xff]   ;;  %v441_v28 = vld [vmem:[#allocation5 + $0x18] sm:$0xff]   ;;  %p496_p10 = scmp.ne.s32.totalorder %s334_s13, %s495_s14  ;;  %p501_p12 = scmp.lt.s32.totalorder %s495_s14, %s495_s14 }
  0x21   :  { %400 = vmatpush3.bf16.msra.mxu1 %v437_v24  ;;  %v440_v27 = vld [vmem:[#allocation5 + $0x20] sm:$0xff]   ;;  %v442_v29 = vld [vmem:[#allocation5 + $0x10] sm:$0xff]   ;;  %v443_v30 = vld [vmem:[#allocation5 + $0x8] sm:$0xff]   ;;  %449 = vrsqrt.f32 %v63_v33 }
  0x22   :  { %401 = vmatprep.subr.bf16.mxu1 %v526_v1  ;;  %v444_v31 = vld [vmem:[#allocation5] sm:$0xff]   ;;  %451 = vrcp.f32 %v578_v3  ;;  %p502_p13 = por %p501_p12, %p500_p11 }
  0x23   :  { %382 = vmatpush3.bf16.msra.mxu0 %v430_v5  ;;  %v343_v36 = vld [vmem:[%s621_s3] ss:$0 sm:$0xff] }
  0x24   :  { %383 = vmatprep.subr.bf16.mxu0 %v526_v1  ;;  %v352_v53 = vld [vmem:[%s623_s5] ss:$0 sm:$0xff]  ;;  %p503_p0 = pnand %p502_p13, %p496_p10 }
  0x25   :  { %402 = vmatpush3.bf16.msra.mxu1 %v438_v25 }
  0x26   :  { %403 = vmatprep.subr.bf16.mxu1 %v526_v1 }
  0x27   :  { %384 = vmatpush3.bf16.msra.mxu0 %v431_v6 }
  0x28   :  { %385 = vmatprep.subr.bf16.mxu0 %v526_v1 }
  0x29   :  { %404 = vmatpush3.bf16.msra.mxu1 %v439_v26 }
  0x2a   :  { %v446_v8 = vpop.eup %445  ;;  %405 = vmatprep.subr.bf16.mxu1 %v526_v1 }
  0x2b   :  { %v60_v9 = vmul.f32 0.6931472, %v446_v8  ;;  %386 = vmatpush3.bf16.msra.mxu0 %v432_v7 }
  0x2c   :  { %v448_v11 = vpop.eup %447  ;;  %387 = vmatprep.subr.bf16.mxu0 %v526_v1 }
  0x2d   :  { %70 = vperm.xlu0 %427, %v448_v11   ;;  %v61_v12 = vmul.f32 0.125, %v60_v9  ;;  %406 = vmatpush3.bf16.msra.mxu1 %v440_v27 }
  0x2e   :  { %407 = vmatprep.subr.bf16.mxu1 %v526_v1  ;;  %v450_v34 = vpop.eup %449 }
  0x2f   :  { %388 = vmatpush3.bf16.msra.mxu0 %v433_v10  ;;  %315 = vperm.xlu1 %428, %v450_v34   ;;  %v452_v35 = vpop.eup %451 }
  0x30   :  { %389 = vmatprep.subr.bf16.mxu0 %v526_v1 }
  0x31   :  { %76 = vperm.xlu0 %427, %v61_v12   ;;  %408 = vmatpush3.bf16.msra.mxu1 %v441_v28 }
  0x32   :  { %409 = vmatprep.subr.bf16.mxu1 %v526_v1 }
  0x33   :  { %390 = vmatpush3.bf16.msra.mxu0 %v434_v13  ;;  %321 = vperm.xlu1 %428, %v452_v35  }
  0x34   :  { %391 = vmatprep.subr.bf16.mxu0 %v526_v1 }
  0x35   :  { %410 = vmatpush3.bf16.msra.mxu1 %v442_v29 }
  0x36   :  { %411 = vmatprep.subr.bf16.mxu1 %v526_v1 }
  0x37   :  { %392 = vmatpush3.bf16.msra.mxu0 %v435_v14 }
  0x38   :  { %393 = vmatprep.subr.bf16.mxu0 %v526_v1 }
  0x39   :  { %412 = vmatpush3.bf16.msra.mxu1 %v443_v30 }
  0x3a   :  { %413 = vmatprep.subr.bf16.mxu1 %v526_v1 }
  0x3b   :  { %394 = vmatpush3.bf16.msra.mxu0 %v436_v15 }
  0x3d   :  { %414 = vmatpush3.bf16.msra.mxu1 %v444_v31 }
  0xa8   :  { %v71_v18 = vpop.permute.xlu0 %70 }
  0xa9   :  { %v73_v20 = vmul.f32 %v71_v18, %v594_v19 }
  0xaa   :  { %v316_v52 = vpop.permute.xlu1 %315 }
  0xac   :  { %v77_v21 = vpop.permute.xlu0 %76 }
  0xad   :  { %v79_v22 = vsel %vm67_vm1, %v77_v21, %v73_v20 }
  0xae   :  { %v80_v23 = vpack.c.bf16 %v79_v22, %v79_v22  ;;  %v322_v54 = vpop.permute.xlu1 %321 }
  0xaf   :  { %v324_v58 = vmul.f32 %v322_v54, %v594_v19 }
  0xb0   :  { %396 = vmatmul.mubr.bf16.vlgmr.msra.gmra.mxu0 %v80_v23 }
 0x170   :  { %v186_v37 = vpop.f32.mrf.mxu0 }
 0x171   :  { %v187_v38 = vadd.f32 %v343_v36, %v186_v37 }
 0x172   :  { %v397_v39 = vpop.f32.mrf.mxu0 }
 0x173   :  { %v192_v40 = vmul.f32 %v187_v38, %v187_v38 }
 0x174   :  { %v189_v41 = vpop.f32.mrf.mxu0 }
 0x175   :  { %v193_v42 = vmul.f32 %v192_v40, %v187_v38 }
 0x176   :  { %v398_v43 = vpop.f32.mrf.mxu0 }
 0x177   :  { %v194_v44 = vmul.f32 0.044715, %v193_v42 }
 0x179   :  { %v195_v45 = vadd.f32 %v194_v44, %v187_v38 }
 0x17b   :  { %v196_v46 = vmul.f32 0.7978846, %v195_v45 }
 0x17d   :  { %453 = vtanh.f32 %v196_v46 }
 0x18a   :  { %v454_v47 = vpop.eup %453 }
 0x18b   :  { %v198_v48 = vadd.f32 1.0, %v454_v47 }
 0x18d   :  { %v199_v49 = vmul.f32 0.5, %v198_v48 }
 0x18f   :  { %v200_v50 = vmul.f32 %v199_v49, %v187_v38 }
 0x191   :  { %v201_v51 = vpack.c.bf16 %v200_v50, %v200_v50 }
 0x193   :  { %416 = vmatmul.mubr.bf16.vlgmr.msra.gmra.mxu1 %v201_v51 }
 0x253   :  { %v307_v55 = vpop.f32.mrf.mxu1 }
 0x254   :  { %v308_v56 = vadd.f32 %v352_v53, %v307_v55 }
 0x255   :  { %v417_v57 = vpop.f32.mrf.mxu1 }
 0x256   :  { %v318_v59 = vmul.f32 %v316_v52, %v308_v56 }
 0x257   :  { %v310_v60 = vpop.f32.mrf.mxu1 }
 0x258   :  { %v325_v61 = vsub.f32 %v318_v59, %v324_v58 }
 0x259   :  { %v418_v62 = vpop.f32.mrf.mxu1 }
 0x25a   :  { %326 = vst [vmem:[#allocation7] sm:$0xff] %v325_v61 }
 0x25b   :  { %506 = shalt.err (!%p503_p0)
}
 0x25c   :  { %336 = dma.vmem_to_hbm [thread:$0]  %s334_s13, 128, %s624_s6, [#allocation4]  }
 0x25d   :  { %519 = dma.done.wait [#allocation4], 128  }
 0x25e   :  { %520 = vsyncadd [#allocation4], 4294967168 }
 0x25f   :  { %340 = vsyncpa [#allocation3], 1 }
 0x260   :  { %341 = vsyncpa [#allocation6], 1 }
 0x261   :  { %342 = vsyncpa [#allocation4], 1 }

</bundles_post_ra>
